<compile_context>
chip_gen: v6e
topology: v6e:2x2x1
jax: 0.10.0
libtpu: 0.0.40
codegen_flags: <defaults>
</compile_context>

<pallas_src>
import jax
import jax.numpy as jnp
from jax.experimental import pallas as pl
from jax.experimental.pallas import tpu as pltpu


EPS = 1e-5

# VMEM spent on the double-buffered pipeline blocks (in + out + weight + bias).
_VMEM_BUFFER_BUDGET = 16 * 1024 * 1024
# Explicit scoped-VMEM limit: above v5e's 16 MiB default, equal to the v6e/v7x
# 32 MiB scoped default, and well under every generation's physical VMEM.
_VMEM_LIMIT_BYTES = 32 * 1024 * 1024


def _instance_norm_kernel(x_ref, w_ref, b_ref, o_ref):
    """Normalize a (TR, HW) tile of rows; each row is one (batch, channel)."""
    x = x_ref[...]                                              # (TR, HW) f32
    inv_n = 1.0 / x.shape[-1]
    mean = jnp.sum(x, axis=-1, keepdims=True) * inv_n           # (TR, 1)
    # Two-pass (centered) variance for fp32 accuracy; the centered values feed
    # the reduction directly and are not kept live for the apply below.
    d = x - mean
    var = jnp.sum(d * d, axis=-1, keepdims=True) * inv_n        # biased (ddof=0)
    inv_std = jax.lax.rsqrt(var + EPS)                          # EUP rsqrt, always finite
    scale = w_ref[...] * inv_std                                # (TR, 1)
    # weight * (x - mean) * inv_std + bias, recomputing (x - mean) in the apply
    # instead of holding a block-sized 'centered' temporary live.
    o_ref[...] = (x - mean) * scale + b_ref[...]


def _pick_row_tile(bc, hw, itemsize):
    """Largest row tile whose pipeline buffers fit the VMEM budget.

    Per row, the double-buffered pipeline holds:
      in + out blocks : 2 arrays * 2 buffers * hw  * itemsize
      weight + bias   : 2 arrays * 2 buffers * 128 * itemsize  (lane-padded (TR, 1))
    """
    per_row = 4 * hw * itemsize + 4 * 128 * itemsize
    tr = int(_VMEM_BUFFER_BUDGET // max(1, per_row))
    if tr >= bc or bc <= 8:
        # One block spans every row; "full dim" rule lifts the 8-multiple need.
        return bc
    # Tiled: sublane (second-to-last) block dim must be a multiple of 8.
    return max((tr // 8) * 8, 8)


def instance_normalizer(x, weight, bias, *, row_tile=None):
    """InstanceNorm forward. x: (B, C, H, W) float32; weight/bias: (C, 1) or (C,)."""
    x = jnp.asarray(x, jnp.float32)
    b, c, h, w = x.shape
    hw = h * w
    bc = b * c

    x_flat = x.reshape(bc, hw)
    # Pre-broadcast parameters to one row per (batch, channel): ~B*C*4 bytes.
    w_rows = jnp.tile(jnp.asarray(weight, jnp.float32).reshape(c, 1), (b, 1))  # (B*C, 1)
    b_rows = jnp.tile(jnp.asarray(bias, jnp.float32).reshape(c, 1), (b, 1))    # (B*C, 1)

    tr = row_tile if row_tile is not None else _pick_row_tile(bc, hw, x.dtype.itemsize)
    grid = (pl.cdiv(bc, tr),)

    out_flat = pl.pallas_call(
        _instance_norm_kernel,
        out_shape=jax.ShapeDtypeStruct((bc, hw), x.dtype),
        grid_spec=pltpu.PrefetchScalarGridSpec(
            num_scalar_prefetch=0,
            grid=grid,
            in_specs=[
                pl.BlockSpec((tr, hw), lambda i: (i, 0)),
                pl.BlockSpec((tr, 1), lambda i: (i, 0)),
                pl.BlockSpec((tr, 1), lambda i: (i, 0)),
            ],
            out_specs=pl.BlockSpec((tr, hw), lambda i: (i, 0)),
        ),
        compiler_params=pltpu.CompilerParams(
            dimension_semantics=("parallel",),
            vmem_limit_bytes=_VMEM_LIMIT_BYTES,
        ),
    )(x_flat, w_rows, b_rows)

    return out_flat.reshape(b, c, h, w)


def _reference(x, weight, bias):
    b, c, h, w = x.shape
    xf = x.reshape(b, c, h * w)
    mean = xf.mean(axis=2, keepdims=True)
    var = xf.var(axis=2, keepdims=True)  # biased, matches torch var(unbiased=False)
    x_hat = (xf - mean) / jnp.sqrt(var + EPS)
    out = weight.reshape(1, c, 1) * x_hat + bias.reshape(1, c, 1)
    return out.reshape(b, c, h, w)


if __name__ == "__main__":
    key = jax.random.PRNGKey(0)
    k0, k1 = jax.random.split(key)

    # Primary shape, matching the module's NCHW forward.
    B, C, H, W = 2, 4, 16, 16
    x = jax.random.normal(k0, (B, C, H, W), dtype=jnp.float32) * 2.0 + 0.5
    # Parameters per Normalizer.__init__ are ones/zeros of shape (C, 1);
    # use deterministic non-trivial values so the affine path is exercised.
    weight = jnp.ones((C, 1), jnp.float32) + 0.1 * jnp.arange(C, dtype=jnp.float32)[:, None]
    bias = 0.05 * jnp.arange(C, dtype=jnp.float32)[:, None]

    out = jax.block_until_ready(instance_normalizer(x, weight, bias))
    ref = _reference(x, weight, bias)
    assert out.shape == (B, C, H, W)
    assert jnp.allclose(out, ref, atol=1e-4, rtol=1e-4), "mismatch vs reference (primary)"

    # Second check: multi-step grid with a ragged last row tile (B*C = 15, TR = 8)
    # and HW < 128, to exercise masked writeback on the tail block.
    B2, C2, H2, W2 = 3, 5, 8, 8
    x2 = jax.random.normal(k1, (B2, C2, H2, W2), dtype=jnp.float32) - 1.0
    w2 = 0.5 + 0.25 * jnp.arange(C2, dtype=jnp.float32)[:, None]
    b2 = -0.1 * jnp.arange(C2, dtype=jnp.float32)[:, None]
    out2 = jax.block_until_ready(instance_normalizer(x2, w2, b2, row_tile=8))
    assert jnp.allclose(out2, _reference(x2, w2, b2), atol=1e-4, rtol=1e-4), \
        "mismatch vs reference (ragged tile)"

    print("KERNEL_OK")
</pallas_src>

<mosaic_0001>
module attributes {stable_mosaic.version = 11 : i64} {
  func.func @_instance_norm_kernel(%arg0: i32, %arg1: memref<8x256xf32, #tpu.memory_space<vmem>>, %arg2: memref<8x1xf32, #tpu.memory_space<vmem>>, %arg3: memref<8x1xf32, #tpu.memory_space<vmem>>, %arg4: memref<8x256xf32, #tpu.memory_space<vmem>>) attributes {dimension_semantics = [#tpu.dimension_semantics<parallel>], iteration_bounds = array<i64: 1>, scalar_prefetch = 0 : i64, scratch_operands = 0 : i64, tpu.core_type = #tpu.core_type<tc>, window_params = [{transform_indices = @transform_0, window_bounds = array<i64: 8, 256>}, {transform_indices = @transform_1, window_bounds = array<i64: 8, 1>}, {transform_indices = @transform_2, window_bounds = array<i64: 8, 1>}, {transform_indices = @transform_3, window_bounds = array<i64: 8, 256>}]} {
    %c0 = arith.constant 0 : index
    %c0_0 = arith.constant 0 : index
    %0 = vector.load %arg1[%c0, %c0_0] : memref<8x256xf32, #tpu.memory_space<vmem>>, vector<8x256xf32>
    %cst = arith.constant dense<0.000000e+00> : vector<8xf32>
    %1 = vector.multi_reduction <add>, %0, %cst [1] : vector<8x256xf32> to vector<8xf32>
    %2 = vector.shape_cast %1 : vector<8xf32> to vector<8x1xf32>
    %cst_1 = arith.constant 3.906250e-03 : f32
    %3 = vector.broadcast %cst_1 : f32 to vector<8x1xf32>
    %4 = arith.mulf %2, %3 : vector<8x1xf32>
    %5 = vector.broadcast %4 : vector<8x1xf32> to vector<8x256xf32>
    %6 = arith.subf %0, %5 : vector<8x256xf32>
    %7 = arith.mulf %6, %6 : vector<8x256xf32>
    %cst_2 = arith.constant dense<0.000000e+00> : vector<8xf32>
    %8 = vector.multi_reduction <add>, %7, %cst_2 [1] : vector<8x256xf32> to vector<8xf32>
    %9 = vector.shape_cast %8 : vector<8xf32> to vector<8x1xf32>
    %cst_3 = arith.constant 3.906250e-03 : f32
    %10 = vector.broadcast %cst_3 : f32 to vector<8x1xf32>
    %11 = arith.mulf %9, %10 : vector<8x1xf32>
    %cst_4 = arith.constant 9.99999974E-6 : f32
    %12 = vector.broadcast %cst_4 : f32 to vector<8x1xf32>
    %13 = arith.addf %11, %12 : vector<8x1xf32>
    %14 = math.rsqrt %13 : vector<8x1xf32>
    %c0_5 = arith.constant 0 : index
    %c0_6 = arith.constant 0 : index
    %15 = vector.load %arg2[%c0_5, %c0_6] : memref<8x1xf32, #tpu.memory_space<vmem>>, vector<8x1xf32>
    %16 = arith.mulf %15, %14 : vector<8x1xf32>
    %17 = vector.broadcast %4 : vector<8x1xf32> to vector<8x256xf32>
    %18 = arith.subf %0, %17 : vector<8x256xf32>
    %19 = vector.broadcast %16 : vector<8x1xf32> to vector<8x256xf32>
    %20 = arith.mulf %18, %19 : vector<8x256xf32>
    %c0_7 = arith.constant 0 : index
    %c0_8 = arith.constant 0 : index
    %21 = vector.load %arg3[%c0_7, %c0_8] : memref<8x1xf32, #tpu.memory_space<vmem>>, vector<8x1xf32>
    %22 = vector.broadcast %21 : vector<8x1xf32> to vector<8x256xf32>
    %23 = arith.addf %20, %22 : vector<8x256xf32>
    %c0_9 = arith.constant 0 : index
    %c0_10 = arith.constant 0 : index
    %24 = vector.load %arg4[%c0_9, %c0_10] : memref<8x256xf32, #tpu.memory_space<vmem>>, vector<8x256xf32>
    tpu.vector_store %arg4[%c0_9, %c0_10], %23 {strides = array<i32>} : memref<8x256xf32, #tpu.memory_space<vmem>>, vector<8x256xf32>,
    return
  }
  func.func @transform_0(%arg0: i32) -> (i32, i32) {
    %c0_i32 = arith.constant 0 : i32
    %c0_i32_0 = arith.constant 0 : i32
    return %arg0, %c0_i32 : i32, i32
  }
  func.func @transform_1(%arg0: i32) -> (i32, i32) {
    %c0_i32 = arith.constant 0 : i32
    %c0_i32_0 = arith.constant 0 : i32
    return %arg0, %c0_i32 : i32, i32
  }
  func.func @transform_2(%arg0: i32) -> (i32, i32) {
    %c0_i32 = arith.constant 0 : i32
    %c0_i32_0 = arith.constant 0 : i32
    return %arg0, %c0_i32 : i32, i32
  }
  func.func @transform_3(%arg0: i32) -> (i32, i32) {
    %c0_i32 = arith.constant 0 : i32
    %c0_i32_0 = arith.constant 0 : i32
    return %arg0, %c0_i32 : i32, i32
  }
}

</mosaic_0001>

<bundles_post_ra>
// kernel: tpu_custom_call.1
= control target key start
LH: loop header
LB: loop body
LE: loop exit
PB: predicated region body
PF: predicated region fallthrough
CT: control target
= control target key end

     0   :  { %s129_s0 = inlined_call_operand.vmem [shape: f32[8,256], index: 0, kind: input, shape index: {}]   ;;  %s130_s1 = inlined_call_operand.vmem [shape: f32[8,1], index: 1, kind: input, shape index: {}]   ;;  %s131_s2 = inlined_call_operand.vmem [shape: f32[8,1], index: 2, kind: input, shape index: {}]   ;;  %s132_s3 = inlined_call_operand.hbm [shape: f32[8,256], index: 3, kind: output, shape index: {}]  }
   0x1   :  { %v15_v0 = vld [vmem:[%s129_s0] sm:$0xff]  ;;  %v16_v1 = vld [vmem:[%s129_s0 + $0x8] sm:$0xff] }
   0x2   :  { %8 = vsyncpa [#allocation3], 0  ;;  %v17_v2 = vadd.f32 %v16_v1, %v15_v0  ;;  %v92_v10 = vmov 0   ;;  %v31_v14 = vld [vmem:[%s130_s1] sm:$0xff]  ;;  %s93_s19 = smov [#allocation2]  }
   0x3   :  { %66 = vset.pattern.permute.xlu1 %v92_v10  ;;  %67 = vset.pattern.permute.xlu0 %v92_v10  ;;  %v40_v17 = vld [vmem:[%s131_s2] sm:$0xff]  ;;  %s56_s20 = sshll.u32 %s93_s19, 4  ;;  %s57_s20 = int_to_ptr.vmem [resolvable:$true] %s56_s20 }
   0x4   :  { %18 = vadd.xlane.f32.xlu0 %v17_v2  ;;  %s70_s1 = scalar_lea.vmem %s57_s20, 256  ;;  %p75_p1 = scmp.lt.s32.totalorder %s57_s20, %s57_s20 }
   0x5   :  { %p71_p0 = scmp.ne.s32.totalorder %s57_s20, %s70_s1  ;;  %p76_p2 = scmp.lt.s32.totalorder %s70_s1, %s70_s1 }
   0x7   :  { %p77_p3 = por %p76_p2, %p75_p1 }
   0x9   :  { %p78_p4 = pnand %p77_p3, %p71_p0 }
  0x8d   :  { %v19_v3 = vpop.xlane.xlu0 %18 }
  0x8e   :  { %v20_v4 = vmul.f32 0.00390625, %v19_v3 }
  0x90   :  { %v21_v5 = vsub.f32 %v15_v0, %v20_v4  ;;  %v22_v6 = vsub.f32 %v16_v1, %v20_v4 }
  0x92   :  { %v23_v7 = vmul.f32 %v21_v5, %v21_v5  ;;  %v24_v8 = vmul.f32 %v22_v6, %v22_v6 }
  0x94   :  { %v25_v9 = vadd.f32 %v24_v8, %v23_v7 }
  0x96   :  { %26 = vadd.xlane.f32.xlu0 %v25_v9 }
 0x11f   :  { %v27_v11 = vpop.xlane.xlu0 %26 }
 0x120   :  { %v28_v12 = vmul.f32 0.00390625, %v27_v11 }
 0x122   :  { %v29_v13 = vadd.f32 1e-05, %v28_v12 }
 0x124   :  { %68 = vrsqrt.f32 %v29_v13 }
 0x131   :  { %v69_v15 = vpop.eup %68 }
 0x132   :  { %v32_v16 = vmul.f32 %v69_v15, %v31_v14 }
 0x134   :  { %35 = vperm.xlu1 %66, %v32_v16  }
 0x138   :  { %43 = vperm.xlu1 %66, %v40_v17  }
 0x1af   :  { %v36_v18 = vpop.permute.xlu1 %35 }
 0x1b0   :  { %v38_v19 = vmul.f32 %v36_v18, %v21_v5  ;;  %v39_v20 = vmul.f32 %v36_v18, %v22_v6 }
 0x1b3   :  { %v44_v21 = vpop.permute.xlu1 %43 }
 0x1b4   :  { %v46_v22 = vadd.f32 %v44_v21, %v38_v19  ;;  %v47_v23 = vadd.f32 %v44_v21, %v39_v20 }
 0x1b6   :  { %48 = vst [vmem:[#allocation2] sm:$0xff] %v46_v22  ;;  %49 = vst [vmem:[#allocation2 + $0x8] sm:$0xff] %v47_v23 }
 0x1b7   :  { %81 = shalt.err (!%p78_p4)
}
 0x1b8   :  { %59 = dma.vmem_to_hbm [thread:$0]  %s57_s20, 256, %s132_s3, [#allocation3]  }
 0x1b9   :  { %90 = dma.done.wait [#allocation3], 256  }
 0x1ba   :  { %91 = vsyncadd [#allocation3], 4294967040 }
 0x1bb   :  { %63 = vsyncpa [#allocation3], 1 }

</bundles_post_ra>
